<compile_context>
chip_gen: v7x
topology: tpu7x:2x2x1
jax: 0.10.0
libtpu: 0.0.40
codegen_flags: <defaults>
</compile_context>

<pallas_src>
import functools

import jax
import jax.numpy as jnp
from jax.experimental import pallas as pl
from jax.experimental.pallas import tpu as pltpu


LANE = 128  # TPU lane width; channels are padded to a multiple of this.


# ----------------------------- Pallas kernel --------------------------------


def _residual_block_kernel(
    x_ref,      # (Mt, Cp)   bf16  Mt = Bt * L (Bt packed sequences)
    w1_ref,     # (K*Cp, Cp) bf16  im2col-flattened conv1 weight
    b1_ref,     # (1, Cp)    f32
    g1_ref,     # (1, Cp)    f32   LayerNorm-1 weight
    be1_ref,    # (1, Cp)    f32   LayerNorm-1 bias
    w2_ref,     # (K*Cp, Cp) bf16  im2col-flattened conv2 weight
    b2_ref,     # (1, Cp)    f32
    g2_ref,     # (1, Cp)    f32
    be2_ref,    # (1, Cp)    f32
    o_ref,      # (Mt, Cp)   bf16
    patches_ref,  # (Mt, K*Cp) bf16 scratch, reused by both convs
    *,
    K: int,
    d: int,
    L: int,
    C: int,     # real (unpadded) channel count (LayerNorm statistics use this)
    Cp: int,
):
    mt = x_ref.shape[0]

    # Hoisted index vector (JAX does not CSE broadcast_in_dim -> build once and
    # reuse across all taps of both convs).
    row_in_seq = jax.lax.broadcasted_iota(jnp.int32, (mt, 1), 0) % L

    def fill_patches(v32, dil):
        # Writes the K dilated causal taps of v32 (f32, (Mt, Cp)) into the bf16
        # scratch: tap j holds shift(v, (K-1-j)*dil) with causal/pack-boundary
        # rows zeroed.  Rolls/selects stay f32 (safe on all generations); only
        # the store into the scratch narrows to bf16 for the MXU.
        for j in range(K):                       # static taps
            s = (K - 1 - j) * dil
            if s == 0:
                col = v32
            elif s >= L:
                col = jnp.zeros_like(v32)        # tap is entirely in the causal pad
            else:
                rolled = pltpu.roll(v32, shift=s, axis=0)
                # (row % L) >= s zeroes both the causal left-pad and any
                # wrap-around rows from the previously packed sequence.
                col = jnp.where(row_in_seq >= s, rolled, 0.0)
            patches_ref[:, j * Cp:(j + 1) * Cp] = col.astype(jnp.bfloat16)

    def causal_conv(v32, w_ref, b_ref, dil):
        # Single fused MXU matmul: bf16 operands, f32 accumulation.
        fill_patches(v32, dil)
        return (
            jnp.dot(patches_ref[...], w_ref[...], preferred_element_type=jnp.float32)
            + b_ref[...]
        )

    inv_c = 1.0 / C

    def layer_norm_relu(v, g_ref, be_ref):
        # torch.nn.LayerNorm over the real C channels, eps=1e-8, biased variance.
        # Padded lanes of v are exactly zero (weight cols / bias padded with 0),
        # so the sums divided by C give the correct statistics with no mask;
        # gamma/beta are zero-padded so padded output lanes stay exactly 0.
        mu = jnp.sum(v, axis=-1, keepdims=True) * inv_c
        ex2 = jnp.sum(v * v, axis=-1, keepdims=True) * inv_c
        var = jnp.maximum(ex2 - mu * mu, 0.0)
        y = (v - mu) * jax.lax.rsqrt(var + 1e-8) * g_ref[...] + be_ref[...]
        return jnp.maximum(y, 0.0)               # padded lanes stay 0

    xb = x_ref[...]                              # bf16
    x32 = xb.astype(jnp.float32)                 # one widening cast, reused

    out = layer_norm_relu(causal_conv(x32, w1_ref, b1_ref, d), g1_ref, be1_ref)
    out2 = layer_norm_relu(causal_conv(out, w2_ref, b2_ref, 2 * d), g2_ref, be2_ref)
    o_ref[...] = (out2 + x32).astype(o_ref.dtype)


# ------------------------- parameter preparation -----------------------------


def prepare_params(w1, b1, g1, be1, w2, b2, g2, be2, *, kernel_size):
    """One-time transform of PyTorch-layout params into the kernel layout.

    Conv weights arrive in OIHW (C_out, C_in, 1, K); they become im2col-flattened
    (K*Cp, Cp) bf16 matrices with channels zero-padded to a multiple of 128.
    Bias / LayerNorm vectors become (1, Cp) f32 (zero padded).
    Call this once at parameter-load time, not per forward call.
    """
    K = kernel_size
    assert w1.shape[0] == w1.shape[1] == w2.shape[0] == w2.shape[1], (
        "residual `out2 + x` requires in_channel == out_channel")
    C = w1.shape[0]
    Cp = LANE * pl.cdiv(C, LANE)

    def prep_w(w):
        cout, cin = w.shape[0], w.shape[1]
        wr = jnp.transpose(w[:, :, 0, :], (2, 1, 0))              # (K, cin, cout)
        wr = jnp.pad(wr, ((0, 0), (0, Cp - cin), (0, Cp - cout)))
        return wr.reshape(K * Cp, Cp).astype(jnp.bfloat16)

    def prep_v(v):
        return jnp.pad(v.astype(jnp.float32), (0, Cp - v.shape[0])).reshape(1, Cp)

    return (prep_w(w1), prep_v(b1), prep_v(g1), prep_v(be1),
            prep_w(w2), prep_v(b2), prep_v(g2), prep_v(be2))


# -------------------------- layout helpers (API edge) -------------------------


def pack_activations(x, channels_padded=None):
    """(B, L, C) -> lane-dense bf16 (B*L, Cp). Do this once, keep the packed
    layout across a stack of residual blocks."""
    B, L, C = x.shape
    Cp = channels_padded if channels_padded is not None else LANE * pl.cdiv(C, LANE)
    xb = x.astype(jnp.bfloat16)
    if Cp != C:
        xb = jnp.pad(xb, ((0, 0), (0, 0), (0, Cp - C)))
    return xb.reshape(B * L, Cp)


def unpack_activations(x2d, batch, seq_len, channels, dtype=jnp.float32):
    """bf16 (B*L, Cp) -> (B, L, C) in the requested dtype."""
    Cp = x2d.shape[-1]
    return x2d.reshape(batch, seq_len, Cp)[:, :, :channels].astype(dtype)


# ------------------------------- tiling policy --------------------------------


def _has_multiple_tensorcores():
    # v7x packs 2 TensorCores per chip; v5e/v6e have 1 (grid = serial loop).
    try:
        kind = jax.devices()[0].device_kind.lower()
    except Exception:
        return False
    return ("v7" in kind) or ("7x" in kind)


def _vmem_estimate(mt, Cp, K):
    bf = 2
    return int(
        2 * 2 * mt * Cp * bf          # bf16 in + out activation blocks, double-buffered
        + 2 * 2 * K * Cp * Cp * bf    # two conv weights (allow double-buffering)
        + mt * K * Cp * bf            # bf16 patches scratch
        + 8 * mt * Cp * 4             # f32 temporaries (conv out, LN intermediates)
        + (2 << 20))                  # vectors, iotas, slack


def _choose_block_rows(B, L, Cp, K, max_block_rows, multi_core):
    """Pick Bt sequences per grid step: largest block respecting the (8,128)
    constraint, the row budget and a ~40 MiB VMEM budget (safe on v7x's 64 MiB).
    On multi-TC chips prefer grid length >= 2 so steps shard across cores."""
    candidates = [c for c in range(1, B + 1) if B % c == 0 and (c * L) % 8 == 0]
    if not candidates:
        candidates = [B]                      # full-extent block is always legal
    budget = 40 << 20
    fitting = [c for c in candidates
               if c * L <= max_block_rows and _vmem_estimate(c * L, Cp, K) <= budget]
    bt = max(fitting) if fitting else min(candidates)
    if multi_core and B // bt < 2:
        smaller = [c for c in fitting if B // c >= 2 and c * L >= 256]
        if smaller:
            bt = max(smaller)
    return bt


# --------------------------------- wrappers -----------------------------------


@functools.partial(
    jax.jit,
    static_argnames=("seq_len", "channels", "kernel_size", "dilation",
                     "max_block_rows"))
def residual_block_packed(x2d, params, *, seq_len, channels, kernel_size=3,
                          dilation=1, max_block_rows=1024):
    """Core kernel on the packed layout.

    x2d: bf16 (B*L, Cp) lane-dense slab (see pack_activations).
    Returns bf16 (B*L, Cp) in the same layout -> stack blocks without any
    wrapper-side pad / reshape / slice / cast HBM passes.
    """
    M, Cp = x2d.shape
    L, C, K = seq_len, channels, kernel_size
    assert M % L == 0, "rows must be batch * seq_len"
    B = M // L
    w1_r, b1_r, g1_r, be1_r, w2_r, b2_r, g2_r, be2_r = params
    assert w1_r.shape == (K * Cp, Cp) and Cp == LANE * pl.cdiv(C, LANE), (
        "params were prepared for a different channel count / kernel size")

    x2d = x2d.astype(jnp.bfloat16)

    multi_core = _has_multiple_tensorcores()
    bt = _choose_block_rows(B, L, Cp, K, max_block_rows, multi_core)
    mt = bt * L
    grid = (B // bt,)
    vmem_limit = int(min(max(_vmem_estimate(mt, Cp, K), 32 << 20), 64 << 20))

    vec_spec = pl.BlockSpec((1, Cp), lambda i: (0, 0))       # resident across steps
    w_spec = pl.BlockSpec((K * Cp, Cp), lambda i: (0, 0))    # resident across steps

    kernel = functools.partial(
        _residual_block_kernel, K=K, d=dilation, L=L, C=C, Cp=Cp)

    return pl.pallas_call(
        kernel,
        out_shape=jax.ShapeDtypeStruct((M, Cp), jnp.bfloat16),
        grid_spec=pltpu.PrefetchScalarGridSpec(
            num_scalar_prefetch=0,
            grid=grid,
            in_specs=[
                pl.BlockSpec((mt, Cp), lambda i: (i, 0)),
                w_spec, vec_spec, vec_spec, vec_spec,
                w_spec, vec_spec, vec_spec, vec_spec,
            ],
            out_specs=pl.BlockSpec((mt, Cp), lambda i: (i, 0)),
            scratch_shapes=[pltpu.VMEM((mt, K * Cp), jnp.bfloat16)],
        ),
        compiler_params=pltpu.CompilerParams(
            dimension_semantics=("parallel",),
            vmem_limit_bytes=vmem_limit,
        ),
    )(x2d, w1_r, b1_r, g1_r, be1_r, w2_r, b2_r, g2_r, be2_r)


def residual_block(x, params, *, kernel_size=3, dilation=1, max_block_rows=1024):
    """Convenience wrapper: (B, L, C) in, (B, L, C) out.

    For a stack of residual blocks, call pack_activations once, chain
    residual_block_packed, and unpack_activations once at the end instead.
    """
    B, L, C = x.shape
    Cp = params[0].shape[1]
    x2d = pack_activations(x, Cp)
    y2d = residual_block_packed(
        x2d, params, seq_len=L, channels=C, kernel_size=kernel_size,
        dilation=dilation, max_block_rows=max_block_rows)
    return unpack_activations(y2d, B, L, C, x.dtype)


# ------------------------- pure-JAX reference (NCHW) -------------------------


def _reference(x, w1, b1, g1, be1, w2, b2, g2, be2, K, d):
    def causal_conv_nchw(v, w, b, dil):
        pad = (K - 1) * dil
        vp = jnp.transpose(v, (0, 2, 1))[:, :, None, :]            # (B, C, 1, L)
        vp = jnp.pad(vp, ((0, 0), (0, 0), (0, 0), (pad, 0)))       # ZeroPad2d(left)
        y = jax.lax.conv_general_dilated(
            vp, w, (1, 1), "VALID",
            rhs_dilation=(1, dil),
            dimension_numbers=("NCHW", "OIHW", "NCHW"),
            precision=jax.lax.Precision.HIGHEST,
        ) + b[None, :, None, None]
        return jnp.transpose(y[:, :, 0, :], (0, 2, 1))             # squeeze(2).permute(0,2,1)

    def ln_relu(v, g, be):
        mu = jnp.mean(v, axis=-1, keepdims=True)
        var = jnp.mean(jnp.square(v - mu), axis=-1, keepdims=True)
        return jnp.maximum((v - mu) * jax.lax.rsqrt(var + 1e-8) * g + be, 0.0)

    out = ln_relu(causal_conv_nchw(x, w1, b1, d), g1, be1)
    out2 = ln_relu(causal_conv_nchw(out, w2, b2, 2 * d), g2, be2)
    return out2 + x


# ----------------------------------- main ------------------------------------

if __name__ == "__main__":
    B, L, C = 2, 16, 32          # batch, seq_len, in_channel == out_channel
    K, D = 3, 1                  # kernel_size, dilation

    keys = jax.random.split(jax.random.PRNGKey(0), 9)
    x = jax.random.normal(keys[0], (B, L, C), jnp.float32)
    w1 = 0.1 * jax.random.normal(keys[1], (C, C, 1, K), jnp.float32)
    b1 = 0.1 * jax.random.normal(keys[2], (C,), jnp.float32)
    g1 = 1.0 + 0.1 * jax.random.normal(keys[3], (C,), jnp.float32)
    be1 = 0.1 * jax.random.normal(keys[4], (C,), jnp.float32)
    w2 = 0.1 * jax.random.normal(keys[5], (C, C, 1, K), jnp.float32)
    b2 = 0.1 * jax.random.normal(keys[6], (C,), jnp.float32)
    g2 = 1.0 + 0.1 * jax.random.normal(keys[7], (C,), jnp.float32)
    be2 = 0.1 * jax.random.normal(keys[8], (C,), jnp.float32)

    params = prepare_params(w1, b1, g1, be1, w2, b2, g2, be2, kernel_size=K)
    out = residual_block(x, params, kernel_size=K, dilation=D)
    out = jax.block_until_ready(out)

    ref = _reference(x, w1, b1, g1, be1, w2, b2, g2, be2, K, D)
    assert out.shape == (B, L, C) and out.dtype == jnp.float32
    max_err = float(jnp.max(jnp.abs(out - ref)))
    # bf16 activations / bf16 MXU operands / bf16 output vs a HIGHEST-precision
    # f32 reference -> loosened tolerance.
    if not jnp.allclose(out, ref, atol=5e-2, rtol=5e-2):
        raise AssertionError(f"Pallas kernel mismatch vs reference, max_err={max_err}")

    print("KERNEL_OK")
</pallas_src>

<mosaic_0001>
module attributes {stable_mosaic.version = 11 : i64} {
  func.func @_residual_block_kernel(%arg0: i32, %arg1: memref<32x128xbf16, #tpu.memory_space<vmem>>, %arg2: memref<384x128xbf16, #tpu.memory_space<vmem>>, %arg3: memref<1x128xf32, #tpu.memory_space<vmem>>, %arg4: memref<1x128xf32, #tpu.memory_space<vmem>>, %arg5: memref<1x128xf32, #tpu.memory_space<vmem>>, %arg6: memref<384x128xbf16, #tpu.memory_space<vmem>>, %arg7: memref<1x128xf32, #tpu.memory_space<vmem>>, %arg8: memref<1x128xf32, #tpu.memory_space<vmem>>, %arg9: memref<1x128xf32, #tpu.memory_space<vmem>>, %arg10: memref<32x128xbf16, #tpu.memory_space<vmem>>, %arg11: memref<32x384xbf16, #tpu.memory_space<vmem>>) attributes {dimension_semantics = [#tpu.dimension_semantics<parallel>], iteration_bounds = array<i64: 1>, scalar_prefetch = 0 : i64, scratch_operands = 1 : i64, tpu.core_type = #tpu.core_type<tc>, window_params = [{transform_indices = @transform_0, window_bounds = array<i64: 32, 128>}, {pipeline_mode = #tpu.pipeline_mode<synchronous>, transform_indices = @transform_1, window_bounds = array<i64: 384, 128>}, {pipeline_mode = #tpu.pipeline_mode<synchronous>, transform_indices = @transform_2, window_bounds = array<i64: 1, 128>}, {pipeline_mode = #tpu.pipeline_mode<synchronous>, transform_indices = @transform_3, window_bounds = array<i64: 1, 128>}, {pipeline_mode = #tpu.pipeline_mode<synchronous>, transform_indices = @transform_4, window_bounds = array<i64: 1, 128>}, {pipeline_mode = #tpu.pipeline_mode<synchronous>, transform_indices = @transform_5, window_bounds = array<i64: 384, 128>}, {pipeline_mode = #tpu.pipeline_mode<synchronous>, transform_indices = @transform_6, window_bounds = array<i64: 1, 128>}, {pipeline_mode = #tpu.pipeline_mode<synchronous>, transform_indices = @transform_7, window_bounds = array<i64: 1, 128>}, {pipeline_mode = #tpu.pipeline_mode<synchronous>, transform_indices = @transform_8, window_bounds = array<i64: 1, 128>}, {transform_indices = @transform_9, window_bounds = array<i64: 32, 128>}]} {
    %0 = tpu.iota {dimensions = array<i32: 0>} : vector<32x1xi32>
    %c16_i32 = arith.constant 16 : i32
    %c0_i32 = arith.constant 0 : i32
    %1 = arith.cmpi eq, %c16_i32, %c0_i32 : i32
    %c1_i32 = arith.constant 1 : i32
    %2 = arith.select %1, %c1_i32, %c16_i32 : i32
    %3 = vector.broadcast %2 : i32 to vector<32x1xi32>
    %4 = arith.remsi %0, %3 : vector<32x1xi32>
    %c0_i32_0 = arith.constant 0 : i32
    %5 = vector.broadcast %c0_i32_0 : i32 to vector<32x1xi32>
    %6 = arith.cmpi ne, %4, %5 : vector<32x1xi32>
    %c0_i32_1 = arith.constant 0 : i32
    %7 = vector.broadcast %c0_i32_1 : i32 to vector<32x1xi32>
    %8 = arith.cmpi slt, %4, %7 : vector<32x1xi32>
    %c0_i32_2 = arith.constant 0 : i32
    %9 = arith.cmpi slt, %2, %c0_i32_2 : i32
    %10 = vector.broadcast %9 : i1 to vector<32x1xi1>
    %11 = vector.broadcast %10 : vector<32x1xi1> to vector<32x1xi1>
    %12 = arith.xori %8, %11 : vector<32x1xi1>
    %13 = arith.andi %12, %6 : vector<32x1xi1>
    %14 = vector.broadcast %2 : i32 to vector<32x1xi32>
    %15 = arith.addi %4, %14 : vector<32x1xi32>
    %16 = arith.select %13, %15, %4 : vector<32x1xi1>, vector<32x1xi32>
    %c0 = arith.constant 0 : index
    %c0_3 = arith.constant 0 : index
    %17 = vector.load %arg1[%c0, %c0_3] : memref<32x128xbf16, #tpu.memory_space<vmem>>, vector<32x128xbf16>
    %18 = arith.extf %17 : vector<32x128xbf16> to vector<32x128xf32>
    %c2_i32 = arith.constant 2 : i32
    %19 = tpu.dynamic_rotate %18 by %c2_i32 dim 0 : vector<32x128xf32>, i32 -> vector<32x128xf32>
    %c2_i32_4 = arith.constant 2 : i32
    %20 = vector.broadcast %c2_i32_4 : i32 to vector<32x1xi32>
    %21 = arith.cmpi sge, %16, %20 : vector<32x1xi32>
    %cst = arith.constant 0.000000e+00 : f32
    %22 = vector.shape_cast %21 : vector<32x1xi1> to vector<32x1xi1>
    %23 = vector.broadcast %22 : vector<32x1xi1> to vector<32x128xi1>
    %24 = vector.broadcast %cst : f32 to vector<32x128xf32>
    %25 = arith.select %23, %19, %24 : vector<32x128xi1>, vector<32x128xf32>
    %26 = arith.truncf %25 : vector<32x128xf32> to vector<32x128xbf16>
    %c0_5 = arith.constant 0 : index
    %c0_6 = arith.constant 0 : index
    %27 = vector.load %arg11[%c0_5, %c0_6] : memref<32x384xbf16, #tpu.memory_space<vmem>>, vector<32x128xbf16>
    tpu.vector_store %arg11[%c0_5, %c0_6], %26 {strides = array<i32>} : memref<32x384xbf16, #tpu.memory_space<vmem>>, vector<32x128xbf16>,
    %c1_i32_7 = arith.constant 1 : i32
    %28 = tpu.dynamic_rotate %18 by %c1_i32_7 dim 0 : vector<32x128xf32>, i32 -> vector<32x128xf32>
    %c1_i32_8 = arith.constant 1 : i32
    %29 = vector.broadcast %c1_i32_8 : i32 to vector<32x1xi32>
    %30 = arith.cmpi sge, %16, %29 : vector<32x1xi32>
    %cst_9 = arith.constant 0.000000e+00 : f32
    %31 = vector.shape_cast %30 : vector<32x1xi1> to vector<32x1xi1>
    %32 = vector.broadcast %31 : vector<32x1xi1> to vector<32x128xi1>
    %33 = vector.broadcast %cst_9 : f32 to vector<32x128xf32>
    %34 = arith.select %32, %28, %33 : vector<32x128xi1>, vector<32x128xf32>
    %35 = arith.truncf %34 : vector<32x128xf32> to vector<32x128xbf16>
    %c0_10 = arith.constant 0 : index
    %c128 = arith.constant 128 : index
    %36 = vector.load %arg11[%c0_10, %c128] : memref<32x384xbf16, #tpu.memory_space<vmem>>, vector<32x128xbf16>
    tpu.vector_store %arg11[%c0_10, %c128], %35 {strides = array<i32>} : memref<32x384xbf16, #tpu.memory_space<vmem>>, vector<32x128xbf16>,
    %37 = arith.truncf %18 : vector<32x128xf32> to vector<32x128xbf16>
    %c0_11 = arith.constant 0 : index
    %c256 = arith.constant 256 : index
    %38 = vector.load %arg11[%c0_11, %c256] : memref<32x384xbf16, #tpu.memory_space<vmem>>, vector<32x128xbf16>
    tpu.vector_store %arg11[%c0_11, %c256], %37 {strides = array<i32>} : memref<32x384xbf16, #tpu.memory_space<vmem>>, vector<32x128xbf16>,
    %c0_12 = arith.constant 0 : index
    %c0_13 = arith.constant 0 : index
    %39 = vector.load %arg11[%c0_12, %c0_13] : memref<32x384xbf16, #tpu.memory_space<vmem>>, vector<32x384xbf16>
    %c0_14 = arith.constant 0 : index
    %c0_15 = arith.constant 0 : index
    %40 = vector.load %arg2[%c0_14, %c0_15] : memref<384x128xbf16, #tpu.memory_space<vmem>>, vector<384x128xbf16>
    %cst_16 = arith.constant dense<0.000000e+00> : vector<32x128xf32>
    %41 = tpu.matmul %39, %40, %cst_16 {dimension_numbers = #tpu.dot_dimension_numbers<[1], [0], [0], [1], [0, 0, 1, 1], [], []>} : vector<32x384xbf16>, vector<384x128xbf16>, vector<32x128xf32> -> vector<32x128xf32>
    %c0_17 = arith.constant 0 : index
    %c0_18 = arith.constant 0 : index
    %42 = vector.load %arg3[%c0_17, %c0_18] : memref<1x128xf32, #tpu.memory_space<vmem>>, vector<1x128xf32>
    %43 = vector.broadcast %42 : vector<1x128xf32> to vector<32x128xf32>
    %44 = arith.addf %41, %43 : vector<32x128xf32>
    %cst_19 = arith.constant dense<0.000000e+00> : vector<32xf32>
    %45 = vector.multi_reduction <add>, %44, %cst_19 [1] : vector<32x128xf32> to vector<32xf32>
    %46 = vector.shape_cast %45 : vector<32xf32> to vector<32x1xf32>
    %cst_20 = arith.constant 3.125000e-02 : f32
    %47 = vector.broadcast %cst_20 : f32 to vector<32x1xf32>
    %48 = arith.mulf %46, %47 : vector<32x1xf32>
    %49 = arith.mulf %44, %44 : vector<32x128xf32>
    %cst_21 = arith.constant dense<0.000000e+00> : vector<32xf32>
    %50 = vector.multi_reduction <add>, %49, %cst_21 [1] : vector<32x128xf32> to vector<32xf32>
    %51 = vector.shape_cast %50 : vector<32xf32> to vector<32x1xf32>
    %cst_22 = arith.constant 3.125000e-02 : f32
    %52 = vector.broadcast %cst_22 : f32 to vector<32x1xf32>
    %53 = arith.mulf %51, %52 : vector<32x1xf32>
    %54 = arith.mulf %48, %48 : vector<32x1xf32>
    %55 = arith.subf %53, %54 : vector<32x1xf32>
    %cst_23 = arith.constant 0.000000e+00 : f32
    %56 = vector.broadcast %cst_23 : f32 to vector<32x1xf32>
    %57 = arith.maximumf %55, %56 : vector<32x1xf32>
    %58 = vector.broadcast %48 : vector<32x1xf32> to vector<32x128xf32>
    %59 = arith.subf %44, %58 : vector<32x128xf32>
    %cst_24 = arith.constant 9.99999993E-9 : f32
    %60 = vector.broadcast %cst_24 : f32 to vector<32x1xf32>
    %61 = arith.addf %57, %60 : vector<32x1xf32>
    %62 = math.rsqrt %61 : vector<32x1xf32>
    %63 = vector.broadcast %62 : vector<32x1xf32> to vector<32x128xf32>
    %64 = arith.mulf %59, %63 : vector<32x128xf32>
    %c0_25 = arith.constant 0 : index
    %c0_26 = arith.constant 0 : index
    %65 = vector.load %arg4[%c0_25, %c0_26] : memref<1x128xf32, #tpu.memory_space<vmem>>, vector<1x128xf32>
    %66 = vector.broadcast %65 : vector<1x128xf32> to vector<32x128xf32>
    %67 = arith.mulf %64, %66 : vector<32x128xf32>
    %c0_27 = arith.constant 0 : index
    %c0_28 = arith.constant 0 : index
    %68 = vector.load %arg5[%c0_27, %c0_28] : memref<1x128xf32, #tpu.memory_space<vmem>>, vector<1x128xf32>
    %69 = vector.broadcast %68 : vector<1x128xf32> to vector<32x128xf32>
    %70 = arith.addf %67, %69 : vector<32x128xf32>
    %cst_29 = arith.constant 0.000000e+00 : f32
    %71 = vector.broadcast %cst_29 : f32 to vector<32x128xf32>
    %72 = arith.maximumf %70, %71 : vector<32x128xf32>
    %c4_i32 = arith.constant 4 : i32
    %73 = tpu.dynamic_rotate %72 by %c4_i32 dim 0 : vector<32x128xf32>, i32 -> vector<32x128xf32>
    %c4_i32_30 = arith.constant 4 : i32
    %74 = vector.broadcast %c4_i32_30 : i32 to vector<32x1xi32>
    %75 = arith.cmpi sge, %16, %74 : vector<32x1xi32>
    %cst_31 = arith.constant 0.000000e+00 : f32
    %76 = vector.shape_cast %75 : vector<32x1xi1> to vector<32x1xi1>
    %77 = vector.broadcast %76 : vector<32x1xi1> to vector<32x128xi1>
    %78 = vector.broadcast %cst_31 : f32 to vector<32x128xf32>
    %79 = arith.select %77, %73, %78 : vector<32x128xi1>, vector<32x128xf32>
    %80 = arith.truncf %79 : vector<32x128xf32> to vector<32x128xbf16>
    %c0_32 = arith.constant 0 : index
    %c0_33 = arith.constant 0 : index
    %81 = vector.load %arg11[%c0_32, %c0_33] : memref<32x384xbf16, #tpu.memory_space<vmem>>, vector<32x128xbf16>
    tpu.vector_store %arg11[%c0_32, %c0_33], %80 {strides = array<i32>} : memref<32x384xbf16, #tpu.memory_space<vmem>>, vector<32x128xbf16>,
    %c2_i32_34 = arith.constant 2 : i32
    %82 = tpu.dynamic_rotate %72 by %c2_i32_34 dim 0 : vector<32x128xf32>, i32 -> vector<32x128xf32>
    %c2_i32_35 = arith.constant 2 : i32
    %83 = vector.broadcast %c2_i32_35 : i32 to vector<32x1xi32>
    %84 = arith.cmpi sge, %16, %83 : vector<32x1xi32>
    %cst_36 = arith.constant 0.000000e+00 : f32
    %85 = vector.shape_cast %84 : vector<32x1xi1> to vector<32x1xi1>
    %86 = vector.broadcast %85 : vector<32x1xi1> to vector<32x128xi1>
    %87 = vector.broadcast %cst_36 : f32 to vector<32x128xf32>
    %88 = arith.select %86, %82, %87 : vector<32x128xi1>, vector<32x128xf32>
    %89 = arith.truncf %88 : vector<32x128xf32> to vector<32x128xbf16>
    %c0_37 = arith.constant 0 : index
    %c128_38 = arith.constant 128 : index
    %90 = vector.load %arg11[%c0_37, %c128_38] : memref<32x384xbf16, #tpu.memory_space<vmem>>, vector<32x128xbf16>
    tpu.vector_store %arg11[%c0_37, %c128_38], %89 {strides = array<i32>} : memref<32x384xbf16, #tpu.memory_space<vmem>>, vector<32x128xbf16>,
    %91 = arith.truncf %72 : vector<32x128xf32> to vector<32x128xbf16>
    %c0_39 = arith.constant 0 : index
    %c256_40 = arith.constant 256 : index
    %92 = vector.load %arg11[%c0_39, %c256_40] : memref<32x384xbf16, #tpu.memory_space<vmem>>, vector<32x128xbf16>
    tpu.vector_store %arg11[%c0_39, %c256_40], %91 {strides = array<i32>} : memref<32x384xbf16, #tpu.memory_space<vmem>>, vector<32x128xbf16>,
    %c0_41 = arith.constant 0 : index
    %c0_42 = arith.constant 0 : index
    %93 = vector.load %arg11[%c0_41, %c0_42] : memref<32x384xbf16, #tpu.memory_space<vmem>>, vector<32x384xbf16>
    %c0_43 = arith.constant 0 : index
    %c0_44 = arith.constant 0 : index
    %94 = vector.load %arg6[%c0_43, %c0_44] : memref<384x128xbf16, #tpu.memory_space<vmem>>, vector<384x128xbf16>
    %cst_45 = arith.constant dense<0.000000e+00> : vector<32x128xf32>
    %95 = tpu.matmul %93, %94, %cst_45 {dimension_numbers = #tpu.dot_dimension_numbers<[1], [0], [0], [1], [0, 0, 1, 1], [], []>} : vector<32x384xbf16>, vector<384x128xbf16>, vector<32x128xf32> -> vector<32x128xf32>
    %c0_46 = arith.constant 0 : index
    %c0_47 = arith.constant 0 : index
    %96 = vector.load %arg7[%c0_46, %c0_47] : memref<1x128xf32, #tpu.memory_space<vmem>>, vector<1x128xf32>
    %97 = vector.broadcast %96 : vector<1x128xf32> to vector<32x128xf32>
    %98 = arith.addf %95, %97 : vector<32x128xf32>
    %cst_48 = arith.constant dense<0.000000e+00> : vector<32xf32>
    %99 = vector.multi_reduction <add>, %98, %cst_48 [1] : vector<32x128xf32> to vector<32xf32>
    %100 = vector.shape_cast %99 : vector<32xf32> to vector<32x1xf32>
    %cst_49 = arith.constant 3.125000e-02 : f32
    %101 = vector.broadcast %cst_49 : f32 to vector<32x1xf32>
    %102 = arith.mulf %100, %101 : vector<32x1xf32>
    %103 = arith.mulf %98, %98 : vector<32x128xf32>
    %cst_50 = arith.constant dense<0.000000e+00> : vector<32xf32>
    %104 = vector.multi_reduction <add>, %103, %cst_50 [1] : vector<32x128xf32> to vector<32xf32>
    %105 = vector.shape_cast %104 : vector<32xf32> to vector<32x1xf32>
    %cst_51 = arith.constant 3.125000e-02 : f32
    %106 = vector.broadcast %cst_51 : f32 to vector<32x1xf32>
    %107 = arith.mulf %105, %106 : vector<32x1xf32>
    %108 = arith.mulf %102, %102 : vector<32x1xf32>
    %109 = arith.subf %107, %108 : vector<32x1xf32>
    %cst_52 = arith.constant 0.000000e+00 : f32
    %110 = vector.broadcast %cst_52 : f32 to vector<32x1xf32>
    %111 = arith.maximumf %109, %110 : vector<32x1xf32>
    %112 = vector.broadcast %102 : vector<32x1xf32> to vector<32x128xf32>
    %113 = arith.subf %98, %112 : vector<32x128xf32>
    %cst_53 = arith.constant 9.99999993E-9 : f32
    %114 = vector.broadcast %cst_53 : f32 to vector<32x1xf32>
    %115 = arith.addf %111, %114 : vector<32x1xf32>
    %116 = math.rsqrt %115 : vector<32x1xf32>
    %117 = vector.broadcast %116 : vector<32x1xf32> to vector<32x128xf32>
    %118 = arith.mulf %113, %117 : vector<32x128xf32>
    %c0_54 = arith.constant 0 : index
    %c0_55 = arith.constant 0 : index
    %119 = vector.load %arg8[%c0_54, %c0_55] : memref<1x128xf32, #tpu.memory_space<vmem>>, vector<1x128xf32>
    %120 = vector.broadcast %119 : vector<1x128xf32> to vector<32x128xf32>
    %121 = arith.mulf %118, %120 : vector<32x128xf32>
    %c0_56 = arith.constant 0 : index
    %c0_57 = arith.constant 0 : index
    %122 = vector.load %arg9[%c0_56, %c0_57] : memref<1x128xf32, #tpu.memory_space<vmem>>, vector<1x128xf32>
    %123 = vector.broadcast %122 : vector<1x128xf32> to vector<32x128xf32>
    %124 = arith.addf %121, %123 : vector<32x128xf32>
    %cst_58 = arith.constant 0.000000e+00 : f32
    %125 = vector.broadcast %cst_58 : f32 to vector<32x128xf32>
    %126 = arith.maximumf %124, %125 : vector<32x128xf32>
    %127 = arith.addf %126, %18 : vector<32x128xf32>
    %128 = arith.truncf %127 : vector<32x128xf32> to vector<32x128xbf16>
    %c0_59 = arith.constant 0 : index
    %c0_60 = arith.constant 0 : index
    %129 = vector.load %arg10[%c0_59, %c0_60] : memref<32x128xbf16, #tpu.memory_space<vmem>>, vector<32x128xbf16>
    tpu.vector_store %arg10[%c0_59, %c0_60], %128 {strides = array<i32>} : memref<32x128xbf16, #tpu.memory_space<vmem>>, vector<32x128xbf16>,
    return
  }
  func.func @transform_0(%arg0: i32) -> (i32, i32) {
    %c0_i32 = arith.constant 0 : i32
    %c0_i32_0 = arith.constant 0 : i32
    return %arg0, %c0_i32 : i32, i32
  }
  func.func @transform_1(%arg0: i32) -> (i32, i32) {
    %c0_i32 = arith.constant 0 : i32
    %c0_i32_0 = arith.constant 0 : i32
    %c0_i32_1 = arith.constant 0 : i32
    return %c0_i32, %c0_i32_0 : i32, i32
  }
  func.func @transform_2(%arg0: i32) -> (i32, i32) {
    %c0_i32 = arith.constant 0 : i32
    %c0_i32_0 = arith.constant 0 : i32
    %c0_i32_1 = arith.constant 0 : i32
    return %c0_i32, %c0_i32_0 : i32, i32
  }
  func.func @transform_3(%arg0: i32) -> (i32, i32) {
    %c0_i32 = arith.constant 0 : i32
    %c0_i32_0 = arith.constant 0 : i32
    %c0_i32_1 = arith.constant 0 : i32
    return %c0_i32, %c0_i32_0 : i32, i32
  }
  func.func @transform_4(%arg0: i32) -> (i32, i32) {
    %c0_i32 = arith.constant 0 : i32
    %c0_i32_0 = arith.constant 0 : i32
    %c0_i32_1 = arith.constant 0 : i32
    return %c0_i32, %c0_i32_0 : i32, i32
  }
  func.func @transform_5(%arg0: i32) -> (i32, i32) {
    %c0_i32 = arith.constant 0 : i32
    %c0_i32_0 = arith.constant 0 : i32
    %c0_i32_1 = arith.constant 0 : i32
    return %c0_i32, %c0_i32_0 : i32, i32
  }
  func.func @transform_6(%arg0: i32) -> (i32, i32) {
    %c0_i32 = arith.constant 0 : i32
    %c0_i32_0 = arith.constant 0 : i32
    %c0_i32_1 = arith.constant 0 : i32
    return %c0_i32, %c0_i32_0 : i32, i32
  }
  func.func @transform_7(%arg0: i32) -> (i32, i32) {
    %c0_i32 = arith.constant 0 : i32
    %c0_i32_0 = arith.constant 0 : i32
    %c0_i32_1 = arith.constant 0 : i32
    return %c0_i32, %c0_i32_0 : i32, i32
  }
  func.func @transform_8(%arg0: i32) -> (i32, i32) {
    %c0_i32 = arith.constant 0 : i32
    %c0_i32_0 = arith.constant 0 : i32
    %c0_i32_1 = arith.constant 0 : i32
    return %c0_i32, %c0_i32_0 : i32, i32
  }
  func.func @transform_9(%arg0: i32) -> (i32, i32) {
    %c0_i32 = arith.constant 0 : i32
    %c0_i32_0 = arith.constant 0 : i32
    return %arg0, %c0_i32 : i32, i32
  }
}

</mosaic_0001>

<bundles_post_ra>
// kernel: residual_block_packed.1
= control target key start
LH: loop header
LB: loop body
LE: loop exit
PB: predicated region body
PF: predicated region fallthrough
CT: control target
= control target key end

     0   :  { %14 = vsyncpa [#allocation4], 0  ;;  %s1742_s0 = inlined_call_operand.hbm [shape: bf16[32,128], index: 0, kind: input, shape index: {}]   ;;  %s1743_s1 = inlined_call_operand.hbm [shape: bf16[384,128], index: 1, kind: input, shape index: {}]   ;;  %s1744_s2 = inlined_call_operand.vmem [shape: f32[1,128], index: 2, kind: input, shape index: {}]   ;;  %s1745_s3 = inlined_call_operand.vmem [shape: f32[1,128], index: 3, kind: input, shape index: {}]   ;;  %s1746_s4 = inlined_call_operand.vmem [shape: f32[1,128], index: 4, kind: input, shape index: {}]   ;;  %s1747_s5 = inlined_call_operand.hbm [shape: bf16[384,128], index: 5, kind: input, shape index: {}]   ;;  %s1748_s6 = inlined_call_operand.vmem [shape: f32[1,128], index: 6, kind: input, shape index: {}]   ;;  %s1749_s7 = inlined_call_operand.vmem [shape: f32[1,128], index: 7, kind: input, shape index: {}]   ;;  %s1750_s8 = inlined_call_operand.vmem [shape: f32[1,128], index: 8, kind: input, shape index: {}]   ;;  %s1751_s9 = inlined_call_operand.hbm [shape: bf16[32,128], index: 9, kind: output, shape index: {}]  }
   0x1   :  { %15 = vsyncpa [#allocation7], 0 }
   0x2   :  { %16 = vsyncpa [#allocation5], 0  ;;  %s1453_s30 = smov [#allocation6]   ;;  %s1454_s11 = smov [#allocation3]  }
   0x3   :  { %s34_s10 = sshll.u32 %s1453_s30, 4  ;;  %s22_s12 = sshll.u32 %s1454_s11, 4  ;;  %s35_s10 = int_to_ptr.vmem [resolvable:$true] %s34_s10  ;;  %s1510_s12 = int_to_ptr.vmem [resolvable:$true] %s22_s12 }
   0x4   :  { %s1359_s15 = scalar_lea.hbm %s1743_s1, 3072 }
   0x5   :  { %p1360_p0 = scmp.ne.s32.totalorder %s1743_s1, %s1359_s15  ;;  %p1363_p1 = scmp.lt.u32.totalorder %s1359_s15, %s1743_s1 }
   0x7   :  { %p1365_p2 = pnand %p1363_p1, %p1360_p0 }
   0x9   :  { %1368 = shalt.err (!%p1365_p2)
}
   0xa   :  { %s1369_s20 = scalar_lea.vmem %s35_s10, 3072  ;;  %p1374_p4 = scmp.lt.s32.totalorder %s35_s10, %s35_s10 }
   0xb   :  { %p1370_p3 = scmp.ne.s32.totalorder %s35_s10, %s1369_s20  ;;  %p1375_p5 = scmp.lt.s32.totalorder %s1369_s20, %s1369_s20 }
   0xd   :  { %p1376_p6 = por %p1375_p5, %p1374_p4 }
   0xf   :  { %p1377_p7 = pnand %p1376_p6, %p1370_p3 }
  0x11   :  { %1380 = shalt.err (!%p1377_p7)
}
  0x12   :  { %s1455_s21 = smov 64   ;;  %s1456_s22 = smov 4  }
  0x13   :  { %40 = dma.hbm_to_vmem [thread:$0]  %s1743_s1, 3072, %s35_s10, [#allocation7], %s1455_s21, %s1455_s21, %s1456_s22  }
  0x14   :  { %s1381_s27 = scalar_lea.hbm %s1742_s0, 256 }
  0x15   :  { %p1382_p8 = scmp.ne.s32.totalorder %s1742_s0, %s1381_s27  ;;  %p1385_p9 = scmp.lt.u32.totalorder %s1381_s27, %s1742_s0 }
  0x17   :  { %p1387_p10 = pnand %p1385_p9, %p1382_p8 }
  0x19   :  { %1390 = shalt.err (!%p1387_p10)
}
  0x1a   :  { %s1391_s13 = scalar_lea.vmem %s1510_s12, 256  ;;  %p1396_p12 = scmp.lt.s32.totalorder %s1510_s12, %s1510_s12 }
  0x1b   :  { %p1392_p11 = scmp.ne.s32.totalorder %s1510_s12, %s1391_s13  ;;  %p1397_p13 = scmp.lt.s32.totalorder %s1391_s13, %s1391_s13 }
  0x1d   :  { %p1398_p0 = por %p1397_p13, %p1396_p12 }
  0x1f   :  { %p1399_p1 = pnand %p1398_p0, %p1392_p11 }
  0x21   :  { %1402 = shalt.err (!%p1399_p1)
}
  0x22   :  { %28 = dma.hbm_to_vmem [thread:$0]  %s1742_s0, 256, %s1510_s12, [#allocation4], %s1455_s21, %s1455_s21, %s1456_s22  }
  0x23   :  { %s1457_s14 = smov [#allocation8]   ;;  %s1403_s18 = scalar_lea.hbm %s1747_s5, 3072 }
  0x24   :  { %s52_s15 = sshll.u32 %s1457_s14, 4  ;;  %p1404_p2 = scmp.ne.s32.totalorder %s1747_s5, %s1403_s18  ;;  %s53_s15 = int_to_ptr.vmem [resolvable:$true] %s52_s15 }
  0x25   :  { %p1407_p3 = scmp.lt.u32.totalorder %s1403_s18, %s1747_s5 }
  0x27   :  { %p1409_p4 = pnand %p1407_p3, %p1404_p2 }
  0x29   :  { %1412 = shalt.err (!%p1409_p4)
}
  0x2a   :  { %s1413_s25 = scalar_lea.vmem %s53_s15, 3072  ;;  %p1418_p6 = scmp.lt.s32.totalorder %s53_s15, %s53_s15 }
  0x2b   :  { %p1414_p5 = scmp.ne.s32.totalorder %s53_s15, %s1413_s25  ;;  %p1419_p7 = scmp.lt.s32.totalorder %s1413_s25, %s1413_s25 }
  0x2d   :  { %p1420_p8 = por %p1419_p7, %p1418_p6 }
  0x2f   :  { %p1421_p9 = pnand %p1420_p8, %p1414_p5 }
  0x31   :  { %1424 = shalt.err (!%p1421_p9)
}
  0x32   :  { %58 = dma.hbm_to_vmem [thread:$0]  %s1747_s5, 3072, %s53_s15, [#allocation7], %s1455_s21, %s1455_s21, %s1456_s22  }
  0x33   :  { %1447 = dma.done.wait [#allocation4], 256  }
  0x34   :  { %1448 = vsyncadd [#allocation4], 4294967040 }
  0x35   :  { %1449 = dma.done.wait [#allocation7], 6144  }
  0x36   :  { %1450 = vsyncadd [#allocation7], 4294961152  ;;  %v1291_v0 = vld [vmem:[#allocation6 + $0x40] sm:$0xff]   ;;  %v1293_v2 = vld [vmem:[#allocation6 + $0x48] sm:$0xff]   ;;  %v75_v10 = vlaneseq  ;;  %vm1458_vm4 = vmmov 1  }
  0x37   :  { %v1292_v1 = vld [vmem:[#allocation6] sm:$0xff]   ;;  %1168 = vmatprep.subr.bf16.mxu0 %v1291_v0  ;;  %v1295_v4 = vld [vmem:[#allocation6 + $0x8] sm:$0xff]   ;;  %v1296_v5 = vld [vmem:[#allocation6 + $0x50] sm:$0xff]  }
  0x38   :  { %1169 = vmatpush3.bf16.msra.mxu0 %v1292_v1  ;;  %v1294_v3 = vld [vmem:[#allocation6 + $0x80] sm:$0xff]   ;;  %v1297_v6 = vld [vmem:[#allocation6 + $0x88] sm:$0xff]   ;;  %v1298_v7 = vld [vmem:[#allocation6 + $0x10] sm:$0xff]   ;;  %v1562_v14 = vshrl.u32 %v75_v10, 7 }
  0x39   :  { %1170 = vmatprep.subr.bf16.mxu0 %v1293_v2  ;;  %1244 = vmatprep.subr.bf16.mxu1 %v1294_v3  ;;  %v1299_v8 = vld [vmem:[#allocation6 + $0x58] sm:$0xff]   ;;  %v1300_v9 = vld [vmem:[#allocation6 + $0x90] sm:$0xff]   ;;  %v1302_v12 = vld [vmem:[#allocation6 + $0x60] sm:$0xff]  }
  0x3a   :  { %1245 = vmatpush3.bf16.msra.mxu1 %v1294_v3  ;;  %v1301_v11 = vld [vmem:[#allocation6 + $0x18] sm:$0xff]   ;;  %v1304_v15 = vld [vmem:[#allocation6 + $0x20] sm:$0xff]   ;;  %v78_v17 = vadd.s32 16, %v1562_v14  ;;  %v1305_v18 = vld [vmem:[#allocation6 + $0x68] sm:$0xff]   ;;  %v1566_v20 = vand.u32 15, %v1562_v14  ;;  %vm169_vm3 = vcmp.lt.s32.totalorder %v1562_v14, 1 }
  0x3b   :  { %1246 = vmatprep.subr.bf16.mxu1 %v1297_v6  ;;  %v1303_v13 = vld [vmem:[#allocation6 + $0x98] sm:$0xff]   ;;  %v1306_v16 = vld [vmem:[#allocation6 + $0xa0] sm:$0xff]   ;;  %v1307_v19 = vld [vmem:[#allocation6 + $0x28] sm:$0xff]   ;;  %vm140_vm6 = vcmp.lt.s32.totalorder %v1562_v14, 2  ;;  %vm597_vm11 = vcmp.lt.s32.totalorder %v1562_v14, 4 }
  0x3c   :  { %1171 = vmatpush3.bf16.msra.mxu0 %v1295_v4  ;;  %v1309_v21 = vld [vmem:[#allocation6 + $0xa8] sm:$0xff]   ;;  %v1568_v22 = vand.u32 15, %v78_v17  ;;  %v1308_v23 = vld [vmem:[#allocation6 + $0x70] sm:$0xff]   ;;  %vm174_vm0 = vcmp.ge.s32.totalorder %v1566_v20, 1  ;;  %v131_v27 = vld [vmem:[#allocation3 + $0x8] sm:$0xff]   ;;  %vm145_vm1 = vcmp.ge.s32.totalorder %v1566_v20, 2 }
  0x3d   :  { %1172 = vmatprep.subr.bf16.mxu0 %v1296_v5  ;;  %v1310_v24 = vld [vmem:[#allocation6 + $0x30] sm:$0xff]   ;;  %v1311_v28 = vld [vmem:[#allocation6 + $0x78] sm:$0xff]   ;;  %v1577_v31 = vunpack.c.h.bf16 %v131_v27  ;;  %vm1583_vm5 = vmpackc.low %vm1458_vm4, %vm174_vm0  ;;  %v1588_v34 = vunpack.c.l.bf16 %v131_v27  ;;  %vm602_vm12 = vcmp.ge.s32.totalorder %v1566_v20, 4 }
  0x3e   :  { %1247 = vmatpush3.bf16.msra.mxu1 %v1297_v6  ;;  %v1312_v25 = vld [vmem:[#allocation6 + $0xb0] sm:$0xff]   ;;  %vm176_vm2 = vcmp.ge.s32.totalorder %v1568_v22, 1  ;;  %v1313_v32 = vld [vmem:[#allocation6 + $0x38] sm:$0xff]   ;;  %vm147_vm7 = vcmp.ge.s32.totalorder %v1568_v22, 2  ;;  %vm1598_vm8 = vmpackc.low %vm1458_vm4, %vm145_vm1  ;;  %vm604_vm14 = vcmp.ge.s32.totalorder %v1568_v22, 4 }
  0x3f   :  { %1248 = vmatprep.subr.bf16.mxu1 %v1300_v9  ;;  %v128_v26 = vld [vmem:[#allocation3] sm:$0xff]   ;;  %v168_v37 = vrot.slane %v1577_v31, 7  ;;  %v1314_v40 = vld [vmem:[#allocation6 + $0xb8] sm:$0xff]   ;;  %v139_v42 = vrot.slane %v1577_v31, 6  ;;  %v138_v43 = vrot.slane %v1588_v34, 6  ;;  %v167_v44 = vrot.slane %v1588_v34, 7  ;;  %vm1609_vm9 = vmpackc.low %vm1458_vm4, %vm176_vm2 }
  0x40   :  { %1173 = vmatpush3.bf16.msra.mxu0 %v1298_v7  ;;  %v1573_v29 = vunpack.c.l.bf16 %v128_v26  ;;  %v1575_v30 = vunpack.c.h.bf16 %v128_v26  ;;  %1260 = vmatprep.mubr.bf16.mxu1 %v128_v26  ;;  %vm1630_vm10 = vmpackc.low %vm1458_vm4, %vm147_vm7  ;;  %v1071_v61 = vld [vmem:[%s1744_s2] ss:$0 sm:$0xff]  ;;  %v1320_v33 = vld [vmem:[#allocation8 + $0x48] sm:$0xff]  }
  0x41   :  { %1174 = vmatprep.subr.bf16.mxu0 %v1299_v8  ;;  %v170_v51 = vsel %vm169_vm3, %v167_v44, %v168_v37  ;;  %v141_v56 = vsel %vm140_vm6, %v138_v43, %v139_v42  ;;  %v1330_v45 = vld [vmem:[#allocation8 + $0xa0] sm:$0xff]   ;;  %vm1159_vm13 = vmpackc.low %vm1458_vm4, %vm602_vm12  ;;  %v1098_v22 = vld [vmem:[%s1748_s6] ss:$0 sm:$0xff] }
  0x42   :  { %1249 = vmatpush3.bf16.msra.mxu1 %v1300_v9  ;;  %v165_v35 = vrot.slane %v1573_v29, 7  ;;  %v166_v36 = vrot.slane %v1575_v30, 7  ;;  %v136_v38 = vrot.slane %v1573_v29, 6  ;;  %v137_v41 = vrot.slane %v1575_v30, 6  ;;  %vm1165_vm15 = vmpackc.low %vm1458_vm4, %vm604_vm14 }
  0x43   :  { %1250 = vmatprep.subr.bf16.mxu1 %v1303_v13 }
  0x44   :  { %1175 = vmatpush3.bf16.msra.mxu0 %v1301_v11  ;;  %v172_v46 = vsel %vm169_vm3, %v165_v35, %v166_v36  ;;  %v173_v47 = vsel %vm169_vm3, %v168_v37, %v165_v35  ;;  %v143_v49 = vsel %vm140_vm6, %v136_v38, %v137_v41  ;;  %v144_v50 = vsel %vm140_vm6, %v139_v42, %v136_v38  ;;  %v1321_v35 = vld [vmem:[#allocation8 + $0x88] sm:$0xff]   ;;  %v1323_v37 = vld [vmem:[#allocation8 + $0x50] sm:$0xff]   ;;  %v1327_v42 = vld [vmem:[#allocation8 + $0x98] sm:$0xff]  }
  0x45   :  { %1176 = vmatprep.subr.bf16.mxu0 %v1302_v12  ;;  %v1145_v48 = vpack.c.bf16 %v172_v46, %v173_v47  ;;  %v1148_v52 = vpack.c.bf16 %v143_v49, %v144_v50  ;;  %v171_v53 = vsel %vm169_vm3, %v166_v36, %v167_v44  ;;  %v142_v57 = vsel %vm140_vm6, %v137_v41, %v138_v43  ;;  %v1322_v36 = vld [vmem:[#allocation8 + $0x8] sm:$0xff]   ;;  %v1324_v38 = vld [vmem:[#allocation8 + $0x90] sm:$0xff]   ;;  %v1326_v41 = vld [vmem:[#allocation8 + $0x58] sm:$0xff]  }
  0x46   :  { %1251 = vmatpush3.bf16.msra.mxu1 %v1303_v13  ;;  %v1151_v54 = vpack.c.bf16 %v170_v51, %v171_v53  ;;  %v1154_v58 = vpack.c.bf16 %v141_v56, %v142_v57  ;;  %v1328_v43 = vld [vmem:[#allocation8 + $0x18] sm:$0xff]   ;;  %v1329_v44 = vld [vmem:[#allocation8 + $0x60] sm:$0xff]   ;;  %v1332_v47 = vld [vmem:[#allocation8 + $0x68] sm:$0xff]  }
  0x47   :  { %1252 = vmatprep.subr.bf16.mxu1 %v1306_v16  ;;  %1146 = vmatprep.mubr.msk.bf16.mxu0 %vm1583_vm5, %v1145_v48  ;;  %v1331_v46 = vld [vmem:[#allocation8 + $0x20] sm:$0xff]   ;;  %v1333_v48 = vld [vmem:[#allocation8 + $0xa8] sm:$0xff]   ;;  %v1335_v50 = vld [vmem:[#allocation8 + $0x70] sm:$0xff]  }
  0x48   :  { %1177 = vmatpush3.bf16.msra.mxu0 %v1304_v15  ;;  %v1334_v49 = vld [vmem:[#allocation8 + $0x28] sm:$0xff]   ;;  %v1336_v51 = vld [vmem:[#allocation8 + $0xb0] sm:$0xff]   ;;  %v1338_v53 = vld [vmem:[#allocation8 + $0x78] sm:$0xff]  }
  0x49   :  { %1178 = vmatprep.subr.bf16.mxu0 %v1305_v18  ;;  %v1340_v56 = vld [vmem:[#allocation8 + $0x38] sm:$0xff]  }
  0x4a   :  { %1253 = vmatpush3.bf16.msra.mxu1 %v1306_v16 }
  0x4b   :  { %1254 = vmatprep.subr.bf16.mxu1 %v1309_v21 }
  0x4c   :  { %1179 = vmatpush3.bf16.msra.mxu0 %v1307_v19 }
  0x4d   :  { %1180 = vmatprep.subr.bf16.mxu0 %v1308_v23 }
  0x4e   :  { %1255 = vmatpush3.bf16.msra.mxu1 %v1309_v21 }
  0x4f   :  { %1256 = vmatprep.subr.bf16.mxu1 %v1312_v25 }
  0x50   :  { %1181 = vmatpush3.bf16.msra.mxu0 %v1310_v24 }
  0x51   :  { %1182 = vmatprep.subr.bf16.mxu0 %v1311_v28  ;;  %v1318_v28 = vld [vmem:[#allocation8 + $0x80] sm:$0xff]  }
  0x52   :  { %1257 = vmatpush3.bf16.msra.mxu1 %v1312_v25 }
  0x53   :  { %1258 = vmatprep.subr.bf16.mxu1 %v1314_v40 }
  0x54   :  { %1183 = vmatpush3.bf16.msra.mxu0 %v1313_v32  ;;  %v1319_v32 = vld [vmem:[#allocation8] sm:$0xff]  }
  0x56   :  { %1259 = vmatpush3.bf16.msra.mxu1 %v1314_v40  ;;  %v1325_v40 = vld [vmem:[#allocation8 + $0x10] sm:$0xff]  }
  0x57   :  { %1149 = vmatmul.mubr.msk.bf16.vlgmr.msra.gmra.mrb[0].mxu0 %vm1598_vm8, %v1148_v52  ;;  %1264 = vmatprep.subr.bf16.mxu1 %v1318_v28  ;;  %v1337_v52 = vld [vmem:[#allocation8 + $0x30] sm:$0xff]  }
  0x58   :  { %1152 = vmatprep.mubr.msk.bf16.mxu0 %vm1609_vm9, %v1151_v54  ;;  %v1339_v54 = vld [vmem:[#allocation8 + $0xb8] sm:$0xff]  }
  0x59   :  { %1261 = vmatmul.mubr.bf16.vlgmr.msra.gmra.mrb[0].mxu1 %v131_v27  ;;  %v1317_v27 = vld [vmem:[#allocation8 + $0x40] sm:$0xff]  }
  0x5a   :  { %1206 = vmatprep.subr.bf16.mxu0 %v1317_v27  ;;  %1265 = vmatpush3.bf16.msra.mxu1 %v1318_v28 }
  0x5b   :  { %1207 = vmatpush3.bf16.msra.mxu0 %v1319_v32  ;;  %1266 = vmatprep.subr.bf16.mxu1 %v1321_v35 }
  0x5c   :  { %1208 = vmatprep.subr.bf16.mxu0 %v1320_v33 }
  0x5e   :  { %1267 = vmatpush3.bf16.msra.mxu1 %v1321_v35 }
  0x5f   :  { %1155 = vmatmul.mubr.msk.bf16.gmra.mrb[4].mxu0 %vm1630_vm10, %v1154_v58  ;;  %1268 = vmatprep.subr.bf16.mxu1 %v1324_v38 }
  0x60   :  { %1209 = vmatpush3.bf16.msra.mxu0 %v1322_v36 }
  0x61   :  { %1210 = vmatprep.subr.bf16.mxu0 %v1323_v37 }
  0x62   :  { %1269 = vmatpush3.bf16.msra.mxu1 %v1324_v38  ;;  %v1096_v38 = vld [vmem:[%s1745_s3] ss:$0 sm:$0xff] }
  0x63   :  { %1270 = vmatprep.subr.bf16.mxu1 %v1327_v42 }
  0x64   :  { %1211 = vmatpush3.bf16.msra.mxu0 %v1325_v40 }
  0x65   :  { %1212 = vmatprep.subr.bf16.mxu0 %v1326_v41 }
  0x66   :  { %1271 = vmatpush3.bf16.msra.mxu1 %v1327_v42 }
  0x67   :  { %1272 = vmatprep.subr.bf16.mxu1 %v1330_v45 }
  0x68   :  { %1213 = vmatpush3.bf16.msra.mxu0 %v1328_v43 }
  0x69   :  { %1214 = vmatprep.subr.bf16.mxu0 %v1329_v44 }
  0x6a   :  { %1273 = vmatpush3.bf16.msra.mxu1 %v1330_v45 }
  0x6b   :  { %1274 = vmatprep.subr.bf16.mxu1 %v1333_v48 }
  0x6c   :  { %1215 = vmatpush3.bf16.msra.mxu0 %v1331_v46 }
  0x6d   :  { %1216 = vmatprep.subr.bf16.mxu0 %v1332_v47 }
  0x6e   :  { %1275 = vmatpush3.bf16.msra.mxu1 %v1333_v48 }
  0x6f   :  { %1276 = vmatprep.subr.bf16.mxu1 %v1336_v51 }
  0x70   :  { %1217 = vmatpush3.bf16.msra.mxu0 %v1334_v49 }
  0x71   :  { %1218 = vmatprep.subr.bf16.mxu0 %v1335_v50 }
  0x72   :  { %1277 = vmatpush3.bf16.msra.mxu1 %v1336_v51 }
  0x73   :  { %1278 = vmatprep.subr.bf16.mxu1 %v1339_v54 }
  0x74   :  { %1219 = vmatpush3.bf16.msra.mxu0 %v1337_v52 }
  0x75   :  { %1220 = vmatprep.subr.bf16.mxu0 %v1338_v53 }
  0x76   :  { %1279 = vmatpush3.bf16.msra.mxu1 %v1339_v54 }
  0x78   :  { %1221 = vmatpush3.bf16.msra.mxu0 %v1340_v56 }
 0x12a   :  { %v1184_v59 = vpop.f32.mrb[0].mxu0 }
 0x12b   :  { %v1185_v60 = vpop.f32.mrb[1].mxu0 }
 0x12c   :  { %v1186_v62 = vadd.f32 %v1185_v60, %v1184_v59  ;;  %v1187_v63 = vpop.f32.mrb[2].mxu0  ;;  %v1262_v1 = vpop.f32.mrb[0].mxu1 }
 0x12d   :  { %v1188_v0 = vpop.f32.mrb[3].mxu0  ;;  %v496_v4 = vpop.f32.mrb[1].mxu1 }
 0x12e   :  { %v1189_v2 = vadd.f32 %v1188_v0, %v1187_v63  ;;  %v448_v3 = vadd.f32 %v1186_v62, %v1071_v61  ;;  %v1263_v5 = vpop.f32.mrb[2].mxu1 }
 0x12f   :  { %v499_v8 = vpop.f32.mrb[3].mxu1 }
 0x130   :  { %v1647_v6 = vadd.f32 %v496_v4, %v448_v3  ;;  %v451_v7 = vadd.f32 %v1189_v2, %v1071_v61 }
 0x132   :  { %v1649_v9 = vadd.f32 %v499_v8, %v451_v7  ;;  %v1190_v10 = vpop.f32.mrb[4].mxu0  ;;  %511 = vadd.xlane.f32.xlu0 %v1647_v6  ;;  %v523_v11 = vmul.f32 %v1647_v6, %v1647_v6 }
 0x133   :  { %v1191_v12 = vpop.f32.mrb[5].mxu0 }
 0x134   :  { %v1192_v13 = vadd.f32 %v1191_v12, %v1190_v10  ;;  %v1193_v15 = vpop.f32.mrb[6].mxu0  ;;  %527 = vadd.xlane.f32.xlu1 %v523_v11  ;;  %v524_v21 = vmul.f32 %v1649_v9, %v1649_v9 }
 0x135   :  { %v1194_v16 = vpop.f32.mrb[7].mxu0 }
 0x136   :  { %v456_v17 = vadd.f32 %v1192_v13, %v1071_v61  ;;  %v1195_v18 = vadd.f32 %v1194_v16, %v1193_v15  ;;  %513 = vadd.xlane.f32.xlu0 %v1649_v9 }
 0x138   :  { %v459_v19 = vadd.f32 %v1195_v18, %v1071_v61  ;;  %v1657_v23 = vadd.f32 %v1262_v1, %v456_v17 }
 0x13a   :  { %529 = vadd.xlane.f32.xlu0 %v524_v21  ;;  %v1659_v24 = vadd.f32 %v1263_v5, %v459_v19  ;;  %v525_v26 = vmul.f32 %v1657_v23, %v1657_v23 }
 0x13c   :  { %517 = vadd.xlane.f32.xlu1 %v1659_v24  ;;  %v526_v25 = vmul.f32 %v1659_v24, %v1659_v24 }
 0x13e   :  { %515 = vadd.xlane.f32.xlu0 %v1657_v23 }
 0x140   :  { %533 = vadd.xlane.f32.xlu1 %v526_v25 }
 0x144   :  { %531 = vadd.xlane.f32.xlu1 %v525_v26 }
 0x1bf   :  { %v512_v57 = vpop.xlane.xlu0 %511 }
 0x1c0   :  { %v519_v58 = vmul.f32 0.03125, %v512_v57 }
 0x1c1   :  { %v528_v59 = vpop.xlane.xlu1 %527 }
 0x1c2   :  { %v539_v60 = vmul.f32 %v519_v58, %v519_v58  ;;  %v535_v61 = vmul.f32 0.03125, %v528_v59  ;;  %v551_v28 = vsub.f32 %v1647_v6, %v519_v58  ;;  %v1097_v6 = vld [vmem:[%s1746_s4] ss:$0 sm:$0xff] }
 0x1c3   :  { %v514_v62 = vpop.xlane.xlu0 %513 }
 0x1c4   :  { %v543_v63 = vsub.f32 %v535_v61, %v539_v60  ;;  %v520_v0 = vmul.f32 0.03125, %v514_v62 }
 0x1c6   :  { %v547_v1 = vmax.f32 %v543_v63, 0.0  ;;  %v540_v4 = vmul.f32 %v520_v0, %v520_v0  ;;  %v552_v41 = vsub.f32 %v1649_v9, %v520_v0 }
 0x1c7   :  { %v530_v2 = vpop.xlane.xlu0 %529 }
 0x1c8   :  { %v555_v3 = vadd.f32 1e-08, %v547_v1  ;;  %v536_v5 = vmul.f32 0.03125, %v530_v2 }
 0x1c9   :  { %v518_v7 = vpop.xlane.xlu1 %517 }
 0x1ca   :  { %1343 = vrsqrt.f32 %v555_v3  ;;  %v544_v8 = vsub.f32 %v536_v5, %v540_v4  ;;  %v522_v10 = vmul.f32 0.03125, %v518_v7 }
 0x1cb   :  { %v516_v11 = vpop.xlane.xlu0 %515 }
 0x1cc   :  { %v548_v12 = vmax.f32 %v544_v8, 0.0  ;;  %v542_v16 = vmul.f32 %v522_v10, %v522_v10  ;;  %v521_v17 = vmul.f32 0.03125, %v516_v11  ;;  %v554_v47 = vsub.f32 %v1659_v24, %v522_v10 }
 0x1cd   :  { %v534_v13 = vpop.xlane.xlu1 %533 }
 0x1ce   :  { %v556_v15 = vadd.f32 1e-08, %v548_v12  ;;  %v538_v18 = vmul.f32 0.03125, %v534_v13  ;;  %v541_v25 = vmul.f32 %v521_v17, %v521_v17  ;;  %v553_v53 = vsub.f32 %v1657_v23, %v521_v17 }
 0x1d0   :  { %1345 = vrsqrt.f32 %v556_v15  ;;  %v546_v19 = vsub.f32 %v538_v18, %v542_v16 }
 0x1d1   :  { %v532_v21 = vpop.xlane.xlu1 %531 }
 0x1d2   :  { %v550_v26 = vmax.f32 %v546_v19, 0.0  ;;  %v537_v27 = vmul.f32 0.03125, %v532_v21 }
 0x1d4   :  { %v1344_v32 = vpop.eup %1343  ;;  %v558_v33 = vadd.f32 1e-08, %v550_v26  ;;  %v545_v35 = vsub.f32 %v537_v27, %v541_v25 }
 0x1d5   :  { %v563_v36 = vmul.f32 %v1344_v32, %v551_v28 }
 0x1d6   :  { %1347 = vrsqrt.f32 %v558_v33  ;;  %v549_v37 = vmax.f32 %v545_v35, 0.0 }
 0x1d7   :  { %v574_v42 = vmul.f32 %v1096_v38, %v563_v36 }
 0x1d8   :  { %v557_v40 = vadd.f32 1e-08, %v549_v37 }
 0x1d9   :  { %v585_v46 = vadd.f32 %v1097_v6, %v574_v42 }
 0x1da   :  { %v1346_v43 = vpop.eup %1345  ;;  %1349 = vrsqrt.f32 %v557_v40 }
 0x1db   :  { %v564_v44 = vmul.f32 %v1346_v43, %v552_v41  ;;  %v589_v51 = vmax.f32 %v585_v46, 0.0 }
 0x1dd   :  { %v575_v45 = vmul.f32 %v1096_v38, %v564_v44  ;;  %v593_v24 = vrot.slane %v589_v51, 4  ;;  %v622_v0 = vrot.slane %v589_v51, 6 }
 0x1df   :  { %v586_v48 = vadd.f32 %v1097_v6, %v575_v45 }
 0x1e0   :  { %v1348_v49 = vpop.eup %1347 }
 0x1e1   :  { %v566_v50 = vmul.f32 %v1348_v49, %v554_v47  ;;  %v590_v52 = vmax.f32 %v586_v48, 0.0 }
 0x1e3   :  { %v577_v9 = vmul.f32 %v1096_v38, %v566_v50  ;;  %v638_v54 = vpack.c.bf16 %v590_v52, %v589_v51  ;;  %v594_v59 = vrot.slane %v590_v52, 4  ;;  %v623_v61 = vrot.slane %v590_v52, 6 }
 0x1e4   :  { %v1350_v56 = vpop.eup %1349 }
 0x1e5   :  { %v565_v57 = vmul.f32 %v1350_v56, %v553_v53  ;;  %v588_v58 = vadd.f32 %v1097_v6, %v577_v9  ;;  %1280 = vmatprep.mubr.bf16.mxu1 %v638_v54  ;;  %v600_v23 = vsel %vm597_vm11, %v593_v24, %v594_v59  ;;  %v628_v4 = vsel %vm140_vm6, %v622_v0, %v623_v61 }
 0x1e7   :  { %v592_v60 = vmax.f32 %v588_v58, 0.0  ;;  %v576_v62 = vmul.f32 %v1096_v38, %v565_v57 }
 0x1e9   :  { %v596_v63 = vrot.slane %v592_v60, 4  ;;  %v625_v1 = vrot.slane %v592_v60, 6  ;;  %v587_v2 = vadd.f32 %v1097_v6, %v576_v62 }
 0x1eb   :  { %v601_v3 = vsel %vm597_vm11, %v596_v63, %v593_v24  ;;  %v629_v5 = vsel %vm140_vm6, %v625_v1, %v622_v0  ;;  %v591_v7 = vmax.f32 %v587_v2, 0.0 }
 0x1ec   :  { %v1157_v8 = vpack.c.bf16 %v628_v4, %v629_v5  ;;  %v1160_v20 = vpack.c.bf16 %v600_v23, %v601_v3 }
 0x1ed   :  { %v639_v10 = vpack.c.bf16 %v592_v60, %v591_v7  ;;  %v624_v11 = vrot.slane %v591_v7, 6  ;;  %v595_v12 = vrot.slane %v591_v7, 4 }
 0x1ee   :  { %1158 = vmatprep.mubr.msk.bf16.mxu0 %vm1598_vm8, %v1157_v8 }
 0x1ef   :  { %1161 = vmatmul.mubr.msk.bf16.vlgmr.msra.gmra.mrb[8].mxu0 %vm1159_vm13, %v1160_v20  ;;  %1281 = vmatmul.mubr.bf16.vlgmr.msra.gmra.mrb[4].mxu1 %v639_v10  ;;  %v626_v13 = vsel %vm140_vm6, %v624_v11, %v625_v1  ;;  %v627_v15 = vsel %vm140_vm6, %v623_v61, %v624_v11  ;;  %v598_v17 = vsel %vm597_vm11, %v595_v12, %v596_v63 }
 0x1f0   :  { %v1163_v16 = vpack.c.bf16 %v626_v13, %v627_v15  ;;  %v599_v39 = vsel %vm597_vm11, %v594_v59, %v595_v12 }
 0x1f1   :  { %v1166_v18 = vpack.c.bf16 %v598_v17, %v599_v39 }
 0x1f2   :  { %1164 = vmatprep.mubr.msk.bf16.mxu0 %vm1630_vm10, %v1163_v16 }
 0x1f7   :  { %1167 = vmatmul.mubr.msk.bf16.gmra.mrb[12].mxu0 %vm1165_vm15, %v1166_v18 }
 0x2c2   :  { %v1222_v19 = vpop.f32.mrb[8].mxu0  ;;  %v1282_v21 = vpop.f32.mrb[4].mxu1 }
 0x2c3   :  { %v1223_v25 = vpop.f32.mrb[9].mxu0  ;;  %v930_v26 = vpop.f32.mrb[5].mxu1 }
 0x2c4   :  { %v1224_v55 = vadd.f32 %v1223_v25, %v1222_v19  ;;  %v1225_v27 = vpop.f32.mrb[10].mxu0  ;;  %v1283_v28 = vpop.f32.mrb[6].mxu1 }
 0x2c5   :  { %v1226_v32 = vpop.f32.mrb[11].mxu0  ;;  %v933_v33 = vpop.f32.mrb[7].mxu1 }
 0x2c6   :  { %v882_v35 = vadd.f32 %v1224_v55, %v1098_v22  ;;  %v1227_v14 = vadd.f32 %v1226_v32, %v1225_v27 }
 0x2c8   :  { %v1705_v36 = vadd.f32 %v930_v26, %v882_v35  ;;  %v885_v37 = vadd.f32 %v1227_v14, %v1098_v22 }
 0x2ca   :  { %v1707_v38 = vadd.f32 %v933_v33, %v885_v37  ;;  %945 = vadd.xlane.f32.xlu0 %v1705_v36  ;;  %v1228_v40 = vpop.f32.mrb[12].mxu0  ;;  %v957_v6 = vmul.f32 %v1705_v36, %v1705_v36 }
 0x2cb   :  { %v1229_v41 = vpop.f32.mrb[13].mxu0 }
 0x2cc   :  { %v1230_v42 = vadd.f32 %v1229_v41, %v1228_v40  ;;  %947 = vadd.xlane.f32.xlu1 %v1707_v38  ;;  %v1231_v43 = vpop.f32.mrb[14].mxu0  ;;  %v958_v47 = vmul.f32 %v1707_v38, %v1707_v38 }
 0x2cd   :  { %v1232_v44 = vpop.f32.mrb[15].mxu0 }
 0x2ce   :  { %v890_v45 = vadd.f32 %v1230_v42, %v1098_v22  ;;  %v1233_v46 = vadd.f32 %v1232_v44, %v1231_v43  ;;  %961 = vadd.xlane.f32.xlu0 %v957_v6 }
 0x2d0   :  { %v893_v48 = vadd.f32 %v1233_v46, %v1098_v22  ;;  %963 = vadd.xlane.f32.xlu1 %v958_v47  ;;  %v939_v49 = vadd.f32 %v1282_v21, %v890_v45  ;;  %v1123_v22 = vld [vmem:[%s1749_s7] ss:$0 sm:$0xff]  ;;  %s1459_s7 = smov [#allocation9]  }
 0x2d2   :  { %949 = vadd.xlane.f32.xlu0 %v939_v49  ;;  %v942_v50 = vadd.f32 %v1283_v28, %v893_v48  ;;  %v959_v51 = vmul.f32 %v939_v49, %v939_v49  ;;  %v1124_v28 = vld [vmem:[%s1750_s8] ss:$0 sm:$0xff]  ;;  %s1056_s8 = sshll.u32 %s1459_s7, 4  ;;  %s1057_s8 = int_to_ptr.vmem [resolvable:$true] %s1056_s8 }
 0x2d3   :  { %s1425_s1 = scalar_lea.vmem %s1057_s8, 256  ;;  %p1430_p11 = scmp.lt.s32.totalorder %s1057_s8, %s1057_s8 }
 0x2d4   :  { %951 = vadd.xlane.f32.xlu1 %v942_v50  ;;  %v960_v52 = vmul.f32 %v942_v50, %v942_v50  ;;  %p1426_p10 = scmp.ne.s32.totalorder %s1057_s8, %s1425_s1  ;;  %p1431_p12 = scmp.lt.s32.totalorder %s1425_s1, %s1425_s1 }
 0x2d6   :  { %965 = vadd.xlane.f32.xlu0 %v959_v51  ;;  %p1432_p13 = por %p1431_p12, %p1430_p11 }
 0x2d8   :  { %967 = vadd.xlane.f32.xlu1 %v960_v52  ;;  %p1433_p0 = pnand %p1432_p13, %p1426_p10 }
 0x357   :  { %v946_v53 = vpop.xlane.xlu0 %945 }
 0x358   :  { %v953_v9 = vmul.f32 0.03125, %v946_v53 }
 0x359   :  { %v948_v54 = vpop.xlane.xlu1 %947 }
 0x35a   :  { %v954_v56 = vmul.f32 0.03125, %v948_v54  ;;  %v973_v58 = vmul.f32 %v953_v9, %v953_v9  ;;  %v985_v21 = vsub.f32 %v1705_v36, %v953_v9 }
 0x35b   :  { %v962_v57 = vpop.xlane.xlu0 %961 }
 0x35c   :  { %v969_v59 = vmul.f32 0.03125, %v962_v57  ;;  %v974_v61 = vmul.f32 %v954_v56, %v954_v56  ;;  %v986_v26 = vsub.f32 %v1707_v38, %v954_v56 }
 0x35d   :  { %v964_v60 = vpop.xlane.xlu1 %963 }
 0x35e   :  { %v977_v62 = vsub.f32 %v969_v59, %v973_v58  ;;  %v970_v24 = vmul.f32 0.03125, %v964_v60 }
 0x35f   :  { %v950_v63 = vpop.xlane.xlu0 %949 }
 0x360   :  { %v981_v0 = vmax.f32 %v977_v62, 0.0  ;;  %v978_v1 = vsub.f32 %v970_v24, %v974_v61  ;;  %v955_v2 = vmul.f32 0.03125, %v950_v63 }
 0x361   :  { %v952_v23 = vpop.xlane.xlu1 %951 }
 0x362   :  { %v989_v3 = vadd.f32 1e-08, %v981_v0  ;;  %v982_v4 = vmax.f32 %v978_v1, 0.0  ;;  %v956_v5 = vmul.f32 0.03125, %v952_v23  ;;  %v975_v20 = vmul.f32 %v955_v2, %v955_v2 }
 0x363   :  { %v966_v7 = vpop.xlane.xlu0 %965  ;;  %v987_v37 = vsub.f32 %v939_v49, %v955_v2 }
 0x364   :  { %1351 = vrsqrt.f32 %v989_v3  ;;  %v990_v8 = vadd.f32 1e-08, %v982_v4  ;;  %v971_v10 = vmul.f32 0.03125, %v966_v7  ;;  %v976_v12 = vmul.f32 %v956_v5, %v956_v5 }
 0x365   :  { %v968_v11 = vpop.xlane.xlu1 %967  ;;  %v988_v42 = vsub.f32 %v942_v50, %v956_v5 }
 0x366   :  { %1353 = vrsqrt.f32 %v990_v8  ;;  %v979_v13 = vsub.f32 %v971_v10, %v975_v20  ;;  %v972_v15 = vmul.f32 0.03125, %v968_v11 }
 0x368   :  { %v983_v16 = vmax.f32 %v979_v13, 0.0  ;;  %v980_v17 = vsub.f32 %v972_v15, %v976_v12 }
 0x36a   :  { %v991_v39 = vadd.f32 1e-08, %v983_v16  ;;  %v984_v18 = vmax.f32 %v980_v17, 0.0 }
 0x36c   :  { %1355 = vrsqrt.f32 %v991_v39  ;;  %v992_v19 = vadd.f32 1e-08, %v984_v18 }
 0x36e   :  { %v1352_v25 = vpop.eup %1351  ;;  %1357 = vrsqrt.f32 %v992_v19 }
 0x36f   :  { %v997_v55 = vmul.f32 %v1352_v25, %v985_v21 }
 0x370   :  { %v1354_v27 = vpop.eup %1353 }
 0x371   :  { %v998_v32 = vmul.f32 %v1354_v27, %v986_v26  ;;  %v1008_v33 = vmul.f32 %v1123_v22, %v997_v55 }
 0x373   :  { %v1009_v35 = vmul.f32 %v1123_v22, %v998_v32  ;;  %v1019_v14 = vadd.f32 %v1124_v28, %v1008_v33 }
 0x375   :  { %v1020_v36 = vadd.f32 %v1124_v28, %v1009_v35  ;;  %v1023_v40 = vmax.f32 %v1019_v14, 0.0 }
 0x376   :  { %v1356_v41 = vpop.eup %1355 }
 0x377   :  { %v999_v43 = vmul.f32 %v1356_v41, %v987_v37  ;;  %v1024_v6 = vmax.f32 %v1020_v36, 0.0  ;;  %v1027_v46 = vadd.f32 %v1023_v40, %v1573_v29 }
 0x378   :  { %v1358_v44 = vpop.eup %1357 }
 0x379   :  { %v1000_v45 = vmul.f32 %v1358_v44, %v988_v42  ;;  %v1010_v38 = vmul.f32 %v1123_v22, %v999_v43  ;;  %v1028_v47 = vadd.f32 %v1024_v6, %v1575_v30 }
 0x37b   :  { %v1011_v48 = vmul.f32 %v1123_v22, %v1000_v45  ;;  %v1021_v51 = vadd.f32 %v1124_v28, %v1010_v38  ;;  %v1136_v52 = vpack.c.bf16 %v1028_v47, %v1027_v46 }
 0x37d   :  { %v1022_v53 = vadd.f32 %v1124_v28, %v1011_v48  ;;  %v1025_v9 = vmax.f32 %v1021_v51, 0.0  ;;  %1137 = vst [vmem:[#allocation9] sm:$0xff] %v1136_v52  }
 0x37f   :  { %v1026_v49 = vmax.f32 %v1022_v53, 0.0  ;;  %v1029_v50 = vadd.f32 %v1025_v9, %v1588_v34 }
 0x381   :  { %v1030_v54 = vadd.f32 %v1026_v49, %v1577_v31 }
 0x383   :  { %v1141_v56 = vpack.c.bf16 %v1030_v54, %v1029_v50 }
 0x385   :  { %1143 = vst [vmem:[#allocation9 + $0x8] sm:$0xff] %v1141_v56  }
 0x386   :  { %1436 = shalt.err (!%p1433_p0)
}
 0x387   :  { %s1437_s15 = scalar_lea.hbm %s1751_s9, 256 }
 0x388   :  { %p1438_p1 = scmp.ne.s32.totalorder %s1751_s9, %s1437_s15  ;;  %p1441_p2 = scmp.lt.u32.totalorder %s1437_s15, %s1751_s9 }
 0x38a   :  { %p1443_p3 = pnand %p1441_p2, %p1438_p1 }
 0x38c   :  { %1446 = shalt.err (!%p1443_p3)
}
 0x38d   :  { %1062 = dma.vmem_to_hbm [thread:$0]  %s1057_s8, 256, %s1751_s9, [#allocation5], %s1455_s21, %s1455_s21, %s1456_s22  }
 0x38e   :  { %1451 = dma.done.wait [#allocation5], 256  }
 0x38f   :  { %1452 = vsyncadd [#allocation5], 4294967040 }
 0x390   :  { %1066 = vsyncpa [#allocation4], 1 }
 0x391   :  { %1067 = vsyncpa [#allocation7], 1 }
 0x392   :  { %1068 = vsyncpa [#allocation5], 1 }

</bundles_post_ra>
